<compile_context>
chip_gen: v7x
topology: tpu7x:2x2x1
jax: 0.10.0
libtpu: 0.0.40
codegen_flags: <defaults>
</compile_context>

<pallas_src>
import functools

import jax
import jax.numpy as jnp
from jax.experimental import pallas as pl
from jax.experimental.pallas import tpu as pltpu

_MASK_VALUE = -1e30  # large finite negative: avoids exp(-inf - -inf) NaNs
_VMEM_LIMIT = 64 * 1024 * 1024  # budget against v7x's 64 MiB physical VMEM


def _pick_block(dim, preferred):
    """Largest power-of-two tile <= preferred that divides dim (else full dim)."""
    if dim <= preferred:
        return dim
    b = preferred
    while b >= 8:
        if dim % b == 0:
            return b
        b //= 2
    # TODO(synk): for awkward T prefer padding the sequence over a full-dim tile.
    return dim


# ---------------------------------------------------------------------------
# Kernel 1: fused QKV projection (one full-width matmul, per-head writeback).
# ---------------------------------------------------------------------------
def qkv_proj_kernel(x_ref, w_ref, b_ref, k_ref, q_ref, v_ref, *, n_head, head_dim):
    x = x_ref[0]                                             # (block_t, C)
    y = jnp.dot(x, w_ref[...], preferred_element_type=jnp.float32)
    y = (y + b_ref[...]).astype(k_ref.dtype)                 # (block_t, 3C)
    C = n_head * head_dim
    for h in range(n_head):                                  # static unroll
        lo = h * head_dim
        k_ref[0, h] = y[:, 0 * C + lo: 0 * C + lo + head_dim]
        q_ref[0, h] = y[:, 1 * C + lo: 1 * C + lo + head_dim]
        v_ref[0, h] = y[:, 2 * C + lo: 2 * C + lo + head_dim]


def _qkv_projection(x, w_qkv, b_qkv, *, n_head, head_dim, block_t):
    B, T, C = x.shape
    grid = (B, T // block_t)
    out_sds = jax.ShapeDtypeStruct((B, n_head, T, head_dim), x.dtype)
    o_spec = pl.BlockSpec((1, n_head, block_t, head_dim), lambda b, t: (b, 0, t, 0))

    kern = functools.partial(qkv_proj_kernel, n_head=n_head, head_dim=head_dim)

    cost = pl.CostEstimate(
        flops=2 * B * T * C * 3 * C,
        transcendentals=0,
        bytes_accessed=(B * T * C + 3 * C * C + 3 * C + 3 * B * T * C)
        * x.dtype.itemsize,
    )

    return pl.pallas_call(
        kern,
        out_shape=(out_sds, out_sds, out_sds),
        grid=grid,
        in_specs=[
            pl.BlockSpec((1, block_t, C), lambda b, t: (b, t, 0)),
            pl.BlockSpec((C, 3 * C), lambda b, t: (0, 0)),   # resident weight
            pl.BlockSpec((1, 3 * C), lambda b, t: (0, 0)),   # resident bias
        ],
        out_specs=(o_spec, o_spec, o_spec),
        compiler_params=pltpu.CompilerParams(
            dimension_semantics=("parallel", "parallel"),
            vmem_limit_bytes=_VMEM_LIMIT),
        cost_estimate=cost,
    )(x, w_qkv, b_qkv)


# ---------------------------------------------------------------------------
# Kernel 2: flash attention (online softmax) fused with the output projection.
# ---------------------------------------------------------------------------
def flash_attn_proj_kernel(q_ref, k_ref, v_ref, wp_ref, bp_ref, o_ref,
                           m_ref, l_ref, acc_ref, y_ref,
                           *, block_q, block_k, scale):
    qi = pl.program_id(1)
    h = pl.program_id(2)
    ki = pl.program_id(3)
    num_h = pl.num_programs(2)
    num_k = pl.num_programs(3)

    q_start = qi * block_q
    kv_start = ki * block_k

    @pl.when(ki == 0)
    def _init_head():
        m_ref[...] = jnp.full(m_ref.shape, _MASK_VALUE, jnp.float32)
        l_ref[...] = jnp.zeros(l_ref.shape, jnp.float32)
        acc_ref[...] = jnp.zeros(acc_ref.shape, jnp.float32)

    def _attend(apply_mask):
        q = q_ref[0, 0] * scale            # fold 1/sqrt(hd) into q: O(tq*hd)
        k = k_ref[0, 0]
        # Contract last dims of q and k directly (no materialized k.T).
        s = jax.lax.dot_general(
            q, k, (((1,), (1,)), ((), ())),
            preferred_element_type=jnp.float32)               # (block_q, block_k)
        if apply_mask:  # only diagonal-straddling blocks pay for the mask
            row = q_start + jax.lax.broadcasted_iota(jnp.int32, s.shape, 0)
            col = kv_start + jax.lax.broadcasted_iota(jnp.int32, s.shape, 1)
            s = jnp.where(row >= col, s, _MASK_VALUE)
        m_prev = m_ref[...]
        m_new = jnp.maximum(m_prev, jnp.max(s, axis=-1, keepdims=True))
        alpha = jnp.exp(m_prev - m_new)
        p = jnp.exp(s - m_new)
        l_ref[...] = alpha * l_ref[...] + jnp.sum(p, axis=-1, keepdims=True)
        v = v_ref[0, 0]
        acc_ref[...] = alpha * acc_ref[...] + jnp.dot(
            p.astype(v.dtype), v, preferred_element_type=jnp.float32)
        m_ref[...] = m_new

    # Block is needed iff it is not entirely above the causal diagonal.
    needed = kv_start <= q_start + (block_q - 1)
    # Block is entirely below/on the diagonal -> no mask needed.
    interior = kv_start + (block_k - 1) <= q_start

    @pl.when(jnp.logical_and(needed, interior))
    def _compute_unmasked():
        _attend(False)

    @pl.when(jnp.logical_and(needed, jnp.logical_not(interior)))
    def _compute_masked():
        _attend(True)

    @pl.when(ki == num_k - 1)
    def _finalize_head():
        # Approx reciprocal (EUP, ~free) for low-precision outputs; exact for f32.
        use_approx = jnp.dtype(o_ref.dtype) != jnp.dtype(jnp.float32)
        inv_l = pl.reciprocal(l_ref[...], approx=bool(use_approx))
        out_h = acc_ref[...] * inv_l                          # (block_q, hd) f32
        wp = wp_ref[h]                                        # (hd, C), resident
        # Fold the output projection in per head -> lane-dense (block_q, C).
        contrib = jnp.dot(out_h.astype(wp.dtype), wp,
                          preferred_element_type=jnp.float32)

        @pl.when(h == 0)
        def _():
            y_ref[...] = contrib

        @pl.when(h != 0)
        def _():
            y_ref[...] = y_ref[...] + contrib

        @pl.when(h == num_h - 1)
        def _():
            o_ref[0] = (y_ref[...] + bp_ref[...]).astype(o_ref.dtype)


def _flash_attention_proj(q, k, v, w_proj_h, b_proj, *, block_q, block_k):
    B, H, T, hd = q.shape
    C = w_proj_h.shape[-1]
    grid = (B, T // block_q, H, T // block_k)
    scale = float(hd) ** -0.5

    def q_index_map(b, qi, h, ki):
        return (b, h, qi, 0)

    def kv_index_map(b, qi, h, ki):
        # Clamp to the last causally-needed kv block: fully masked grid steps
        # keep the same block index -> no DMA is issued for them.
        last_needed = (qi * block_q + (block_q - 1)) // block_k
        return (b, h, jnp.minimum(ki, last_needed), 0)

    kern = functools.partial(flash_attn_proj_kernel,
                             block_q=block_q, block_k=block_k, scale=scale)

    cost = pl.CostEstimate(
        flops=2 * B * H * T * T * hd + 2 * B * T * H * hd * C,
        transcendentals=B * H * T * T // 2,
        bytes_accessed=(3 * B * H * T * hd + B * T * C + H * hd * C + C)
        * q.dtype.itemsize,
    )

    return pl.pallas_call(
        kern,
        out_shape=jax.ShapeDtypeStruct((B, T, C), q.dtype),
        grid=grid,
        in_specs=[
            pl.BlockSpec((1, 1, block_q, hd), q_index_map),
            pl.BlockSpec((1, 1, block_k, hd), kv_index_map),
            pl.BlockSpec((1, 1, block_k, hd), kv_index_map),
            pl.BlockSpec((H, hd, C), lambda b, qi, h, ki: (0, 0, 0)),  # resident
            pl.BlockSpec((1, C), lambda b, qi, h, ki: (0, 0)),         # resident
        ],
        out_specs=pl.BlockSpec((1, block_q, C), lambda b, qi, h, ki: (b, qi, 0)),
        scratch_shapes=[
            pltpu.VMEM((block_q, 1), jnp.float32),    # running max  m
            pltpu.VMEM((block_q, 1), jnp.float32),    # running sum  l
            pltpu.VMEM((block_q, hd), jnp.float32),   # per-head attention acc
            pltpu.VMEM((block_q, C), jnp.float32),    # projected output acc
        ],
        compiler_params=pltpu.CompilerParams(
            dimension_semantics=("parallel", "parallel", "arbitrary", "arbitrary"),
            vmem_limit_bytes=_VMEM_LIMIT),
        cost_estimate=cost,
    )(q, k, v, w_proj_h, b_proj)


# ---------------------------------------------------------------------------
# Public wrapper (matches the PyTorch module's forward, eval-mode dropout).
# ---------------------------------------------------------------------------
def causal_self_attention(x, w_qkv, b_qkv, w_proj, b_proj, *, n_head,
                          block_q=256, block_k=512, block_t=512,
                          compute_dtype=None):
    B, T, C = x.shape
    assert C % n_head == 0
    hd = C // n_head

    # Optional low-precision MXU path (bf16 on v6e/v7x); accumulation stays f32.
    if compute_dtype is not None:
        x = x.astype(compute_dtype)
        w_qkv = w_qkv.astype(compute_dtype)
        b_qkv = b_qkv.astype(compute_dtype)
        w_proj = w_proj.astype(compute_dtype)
        b_proj = b_proj.astype(compute_dtype)

    # One-time wrapper-side weight layout plumbing: rows of w_proj are head-major.
    w_proj_h = w_proj.reshape(n_head, hd, C)

    bt = _pick_block(T, block_t)
    bq = _pick_block(T, block_q)
    bk = _pick_block(T, block_k)

    # PyTorch split order of the packed projection: keys, queries, values.
    k, q, v = _qkv_projection(x, w_qkv, b_qkv, n_head=n_head, head_dim=hd,
                              block_t=bt)
    # TODO(synk): nn.Dropout omitted — kernel implements inference/eval behavior.
    return _flash_attention_proj(q, k, v, w_proj_h, b_proj,
                                 block_q=bq, block_k=bk)


def reference_attention(x, w_qkv, b_qkv, w_proj, b_proj, *, n_head):
    """Pure-JAX reference mirroring the PyTorch forward (dropout=eval/identity)."""
    B, T, C = x.shape
    hd = C // n_head
    qkv = x @ w_qkv + b_qkv[0]
    k, q, v = jnp.split(qkv, 3, axis=-1)

    def heads(t):  # (B, T, C) -> (B, H, T, hd)
        return t.reshape(B, T, n_head, hd).transpose(0, 2, 1, 3)

    k, q, v = heads(k), heads(q), heads(v)
    w = jnp.einsum("bhqd,bhkd->bhqk", q, k) * hd ** (-0.5)
    mask = jnp.tril(jnp.ones((T, T), dtype=bool))
    w = jnp.where(mask[None, None], w, -jnp.inf)
    w = jax.nn.softmax(w, axis=-1)
    o = jnp.einsum("bhqk,bhkd->bhqd", w, v)
    o = o.transpose(0, 2, 1, 3).reshape(B, T, C)
    return o @ w_proj + b_proj[0]


if __name__ == "__main__":
    # Small shapes consistent with the module: block_size >= T.
    B, T = 2, 8
    n_embed, n_head = 32, 4

    key = jax.random.PRNGKey(0)
    kx, k1, k2, k3, k4 = jax.random.split(key, 5)

    x = jax.random.normal(kx, (B, T, n_embed), dtype=jnp.float32)

    # nn.Linear(n_embed, 3*n_embed): weight (3C, C) -> stored transposed (C, 3C)
    bound_qkv = 1.0 / (n_embed ** 0.5)
    w_qkv = jax.random.uniform(k1, (n_embed, 3 * n_embed), jnp.float32,
                               -bound_qkv, bound_qkv)
    b_qkv = jax.random.uniform(k2, (1, 3 * n_embed), jnp.float32,
                               -bound_qkv, bound_qkv)

    # nn.Linear(n_embed, n_embed)
    bound_p = 1.0 / (n_embed ** 0.5)
    w_proj = jax.random.uniform(k3, (n_embed, n_embed), jnp.float32,
                                -bound_p, bound_p)
    b_proj = jax.random.uniform(k4, (1, n_embed), jnp.float32,
                                -bound_p, bound_p)

    out = causal_self_attention(x, w_qkv, b_qkv, w_proj, b_proj, n_head=n_head)
    out = jax.block_until_ready(out)

    ref = reference_attention(x, w_qkv, b_qkv, w_proj, b_proj, n_head=n_head)
    assert out.shape == (B, T, n_embed)
    assert jnp.allclose(out, ref, atol=1e-4, rtol=1e-4), "mismatch vs. reference"

    print("KERNEL_OK")
</pallas_src>

<mosaic_0001>
module attributes {stable_mosaic.version = 11 : i64} {
  func.func @qkv_proj_kernel(%arg0: i32, %arg1: i32, %arg2: memref<1x8x32xf32, #tpu.memory_space<vmem>>, %arg3: memref<32x96xf32, #tpu.memory_space<vmem>>, %arg4: memref<1x96xf32, #tpu.memory_space<vmem>>, %arg5: memref<1x4x8x8xf32, #tpu.memory_space<vmem>>, %arg6: memref<1x4x8x8xf32, #tpu.memory_space<vmem>>, %arg7: memref<1x4x8x8xf32, #tpu.memory_space<vmem>>) attributes {dimension_semantics = [#tpu.dimension_semantics<parallel>, #tpu.dimension_semantics<parallel>], iteration_bounds = array<i64: 2, 1>, scalar_prefetch = 0 : i64, scratch_operands = 0 : i64, tpu.core_type = #tpu.core_type<tc>, window_params = [{transform_indices = @transform_0, window_bounds = array<i64: 1, 8, 32>}, {pipeline_mode = #tpu.pipeline_mode<synchronous>, transform_indices = @transform_1, window_bounds = array<i64: 32, 96>}, {pipeline_mode = #tpu.pipeline_mode<synchronous>, transform_indices = @transform_2, window_bounds = array<i64: 1, 96>}, {transform_indices = @transform_3, window_bounds = array<i64: 1, 4, 8, 8>}, {transform_indices = @transform_4, window_bounds = array<i64: 1, 4, 8, 8>}, {transform_indices = @transform_5, window_bounds = array<i64: 1, 4, 8, 8>}]} {
    %c0 = arith.constant 0 : index
    %c0_0 = arith.constant 0 : index
    %c0_1 = arith.constant 0 : index
    %0 = vector.load %arg2[%c0, %c0_0, %c0_1] : memref<1x8x32xf32, #tpu.memory_space<vmem>>, vector<1x8x32xf32>
    %1 = vector.shape_cast %0 : vector<1x8x32xf32> to vector<8x32xf32>
    %c0_2 = arith.constant 0 : index
    %c0_3 = arith.constant 0 : index
    %2 = vector.load %arg3[%c0_2, %c0_3] : memref<32x96xf32, #tpu.memory_space<vmem>>, vector<32x96xf32>
    %cst = arith.constant dense<0.000000e+00> : vector<8x96xf32>
    %3 = tpu.matmul %1, %2, %cst {dimension_numbers = #tpu.dot_dimension_numbers<[1], [0], [0], [1], [0, 0, 1, 1], [], []>} : vector<8x32xf32>, vector<32x96xf32>, vector<8x96xf32> -> vector<8x96xf32>
    %c0_4 = arith.constant 0 : index
    %c0_5 = arith.constant 0 : index
    %4 = vector.load %arg4[%c0_4, %c0_5] : memref<1x96xf32, #tpu.memory_space<vmem>>, vector<1x96xf32>
    %5 = vector.broadcast %4 : vector<1x96xf32> to vector<8x96xf32>
    %6 = arith.addf %3, %5 : vector<8x96xf32>
    %7 = vector.extract_strided_slice %6 {offsets = [0, 0], sizes = [8, 8], strides = [1, 1]} : vector<8x96xf32> to vector<8x8xf32>
    %c0_6 = arith.constant 0 : index
    %c0_7 = arith.constant 0 : index
    %c0_8 = arith.constant 0 : index
    %c0_9 = arith.constant 0 : index
    %8 = vector.load %arg5[%c0_6, %c0_7, %c0_8, %c0_9] : memref<1x4x8x8xf32, #tpu.memory_space<vmem>>, vector<1x1x8x8xf32>
    %9 = vector.shape_cast %8 : vector<1x1x8x8xf32> to vector<8x8xf32>
    %10 = vector.shape_cast %7 : vector<8x8xf32> to vector<1x1x8x8xf32>
    tpu.vector_store %arg5[%c0_6, %c0_7, %c0_8, %c0_9], %10 {strides = array<i32>} : memref<1x4x8x8xf32, #tpu.memory_space<vmem>>, vector<1x1x8x8xf32>,
    %11 = vector.extract_strided_slice %6 {offsets = [0, 32], sizes = [8, 8], strides = [1, 1]} : vector<8x96xf32> to vector<8x8xf32>
    %c0_10 = arith.constant 0 : index
    %c0_11 = arith.constant 0 : index
    %c0_12 = arith.constant 0 : index
    %c0_13 = arith.constant 0 : index
    %12 = vector.load %arg6[%c0_10, %c0_11, %c0_12, %c0_13] : memref<1x4x8x8xf32, #tpu.memory_space<vmem>>, vector<1x1x8x8xf32>
    %13 = vector.shape_cast %12 : vector<1x1x8x8xf32> to vector<8x8xf32>
    %14 = vector.shape_cast %11 : vector<8x8xf32> to vector<1x1x8x8xf32>
    tpu.vector_store %arg6[%c0_10, %c0_11, %c0_12, %c0_13], %14 {strides = array<i32>} : memref<1x4x8x8xf32, #tpu.memory_space<vmem>>, vector<1x1x8x8xf32>,
    %15 = vector.extract_strided_slice %6 {offsets = [0, 64], sizes = [8, 8], strides = [1, 1]} : vector<8x96xf32> to vector<8x8xf32>
    %c0_14 = arith.constant 0 : index
    %c0_15 = arith.constant 0 : index
    %c0_16 = arith.constant 0 : index
    %c0_17 = arith.constant 0 : index
    %16 = vector.load %arg7[%c0_14, %c0_15, %c0_16, %c0_17] : memref<1x4x8x8xf32, #tpu.memory_space<vmem>>, vector<1x1x8x8xf32>
    %17 = vector.shape_cast %16 : vector<1x1x8x8xf32> to vector<8x8xf32>
    %18 = vector.shape_cast %15 : vector<8x8xf32> to vector<1x1x8x8xf32>
    tpu.vector_store %arg7[%c0_14, %c0_15, %c0_16, %c0_17], %18 {strides = array<i32>} : memref<1x4x8x8xf32, #tpu.memory_space<vmem>>, vector<1x1x8x8xf32>,
    %19 = vector.extract_strided_slice %6 {offsets = [0, 8], sizes = [8, 8], strides = [1, 1]} : vector<8x96xf32> to vector<8x8xf32>
    %c0_18 = arith.constant 0 : index
    %c1 = arith.constant 1 : index
    %c0_19 = arith.constant 0 : index
    %c0_20 = arith.constant 0 : index
    %20 = vector.load %arg5[%c0_18, %c1, %c0_19, %c0_20] : memref<1x4x8x8xf32, #tpu.memory_space<vmem>>, vector<1x1x8x8xf32>
    %21 = vector.shape_cast %20 : vector<1x1x8x8xf32> to vector<8x8xf32>
    %22 = vector.shape_cast %19 : vector<8x8xf32> to vector<1x1x8x8xf32>
    tpu.vector_store %arg5[%c0_18, %c1, %c0_19, %c0_20], %22 {strides = array<i32>} : memref<1x4x8x8xf32, #tpu.memory_space<vmem>>, vector<1x1x8x8xf32>,
    %23 = vector.extract_strided_slice %6 {offsets = [0, 40], sizes = [8, 8], strides = [1, 1]} : vector<8x96xf32> to vector<8x8xf32>
    %c0_21 = arith.constant 0 : index
    %c1_22 = arith.constant 1 : index
    %c0_23 = arith.constant 0 : index
    %c0_24 = arith.constant 0 : index
    %24 = vector.load %arg6[%c0_21, %c1_22, %c0_23, %c0_24] : memref<1x4x8x8xf32, #tpu.memory_space<vmem>>, vector<1x1x8x8xf32>
    %25 = vector.shape_cast %24 : vector<1x1x8x8xf32> to vector<8x8xf32>
    %26 = vector.shape_cast %23 : vector<8x8xf32> to vector<1x1x8x8xf32>
    tpu.vector_store %arg6[%c0_21, %c1_22, %c0_23, %c0_24], %26 {strides = array<i32>} : memref<1x4x8x8xf32, #tpu.memory_space<vmem>>, vector<1x1x8x8xf32>,
    %27 = vector.extract_strided_slice %6 {offsets = [0, 72], sizes = [8, 8], strides = [1, 1]} : vector<8x96xf32> to vector<8x8xf32>
    %c0_25 = arith.constant 0 : index
    %c1_26 = arith.constant 1 : index
    %c0_27 = arith.constant 0 : index
    %c0_28 = arith.constant 0 : index
    %28 = vector.load %arg7[%c0_25, %c1_26, %c0_27, %c0_28] : memref<1x4x8x8xf32, #tpu.memory_space<vmem>>, vector<1x1x8x8xf32>
    %29 = vector.shape_cast %28 : vector<1x1x8x8xf32> to vector<8x8xf32>
    %30 = vector.shape_cast %27 : vector<8x8xf32> to vector<1x1x8x8xf32>
    tpu.vector_store %arg7[%c0_25, %c1_26, %c0_27, %c0_28], %30 {strides = array<i32>} : memref<1x4x8x8xf32, #tpu.memory_space<vmem>>, vector<1x1x8x8xf32>,
    %31 = vector.extract_strided_slice %6 {offsets = [0, 16], sizes = [8, 8], strides = [1, 1]} : vector<8x96xf32> to vector<8x8xf32>
    %c0_29 = arith.constant 0 : index
    %c2 = arith.constant 2 : index
    %c0_30 = arith.constant 0 : index
    %c0_31 = arith.constant 0 : index
    %32 = vector.load %arg5[%c0_29, %c2, %c0_30, %c0_31] : memref<1x4x8x8xf32, #tpu.memory_space<vmem>>, vector<1x1x8x8xf32>
    %33 = vector.shape_cast %32 : vector<1x1x8x8xf32> to vector<8x8xf32>
    %34 = vector.shape_cast %31 : vector<8x8xf32> to vector<1x1x8x8xf32>
    tpu.vector_store %arg5[%c0_29, %c2, %c0_30, %c0_31], %34 {strides = array<i32>} : memref<1x4x8x8xf32, #tpu.memory_space<vmem>>, vector<1x1x8x8xf32>,
    %35 = vector.extract_strided_slice %6 {offsets = [0, 48], sizes = [8, 8], strides = [1, 1]} : vector<8x96xf32> to vector<8x8xf32>
    %c0_32 = arith.constant 0 : index
    %c2_33 = arith.constant 2 : index
    %c0_34 = arith.constant 0 : index
    %c0_35 = arith.constant 0 : index
    %36 = vector.load %arg6[%c0_32, %c2_33, %c0_34, %c0_35] : memref<1x4x8x8xf32, #tpu.memory_space<vmem>>, vector<1x1x8x8xf32>
    %37 = vector.shape_cast %36 : vector<1x1x8x8xf32> to vector<8x8xf32>
    %38 = vector.shape_cast %35 : vector<8x8xf32> to vector<1x1x8x8xf32>
    tpu.vector_store %arg6[%c0_32, %c2_33, %c0_34, %c0_35], %38 {strides = array<i32>} : memref<1x4x8x8xf32, #tpu.memory_space<vmem>>, vector<1x1x8x8xf32>,
    %39 = vector.extract_strided_slice %6 {offsets = [0, 80], sizes = [8, 8], strides = [1, 1]} : vector<8x96xf32> to vector<8x8xf32>
    %c0_36 = arith.constant 0 : index
    %c2_37 = arith.constant 2 : index
    %c0_38 = arith.constant 0 : index
    %c0_39 = arith.constant 0 : index
    %40 = vector.load %arg7[%c0_36, %c2_37, %c0_38, %c0_39] : memref<1x4x8x8xf32, #tpu.memory_space<vmem>>, vector<1x1x8x8xf32>
    %41 = vector.shape_cast %40 : vector<1x1x8x8xf32> to vector<8x8xf32>
    %42 = vector.shape_cast %39 : vector<8x8xf32> to vector<1x1x8x8xf32>
    tpu.vector_store %arg7[%c0_36, %c2_37, %c0_38, %c0_39], %42 {strides = array<i32>} : memref<1x4x8x8xf32, #tpu.memory_space<vmem>>, vector<1x1x8x8xf32>,
    %43 = vector.extract_strided_slice %6 {offsets = [0, 24], sizes = [8, 8], strides = [1, 1]} : vector<8x96xf32> to vector<8x8xf32>
    %c0_40 = arith.constant 0 : index
    %c3 = arith.constant 3 : index
    %c0_41 = arith.constant 0 : index
    %c0_42 = arith.constant 0 : index
    %44 = vector.load %arg5[%c0_40, %c3, %c0_41, %c0_42] : memref<1x4x8x8xf32, #tpu.memory_space<vmem>>, vector<1x1x8x8xf32>
    %45 = vector.shape_cast %44 : vector<1x1x8x8xf32> to vector<8x8xf32>
    %46 = vector.shape_cast %43 : vector<8x8xf32> to vector<1x1x8x8xf32>
    tpu.vector_store %arg5[%c0_40, %c3, %c0_41, %c0_42], %46 {strides = array<i32>} : memref<1x4x8x8xf32, #tpu.memory_space<vmem>>, vector<1x1x8x8xf32>,
    %47 = vector.extract_strided_slice %6 {offsets = [0, 56], sizes = [8, 8], strides = [1, 1]} : vector<8x96xf32> to vector<8x8xf32>
    %c0_43 = arith.constant 0 : index
    %c3_44 = arith.constant 3 : index
    %c0_45 = arith.constant 0 : index
    %c0_46 = arith.constant 0 : index
    %48 = vector.load %arg6[%c0_43, %c3_44, %c0_45, %c0_46] : memref<1x4x8x8xf32, #tpu.memory_space<vmem>>, vector<1x1x8x8xf32>
    %49 = vector.shape_cast %48 : vector<1x1x8x8xf32> to vector<8x8xf32>
    %50 = vector.shape_cast %47 : vector<8x8xf32> to vector<1x1x8x8xf32>
    tpu.vector_store %arg6[%c0_43, %c3_44, %c0_45, %c0_46], %50 {strides = array<i32>} : memref<1x4x8x8xf32, #tpu.memory_space<vmem>>, vector<1x1x8x8xf32>,
    %51 = vector.extract_strided_slice %6 {offsets = [0, 88], sizes = [8, 8], strides = [1, 1]} : vector<8x96xf32> to vector<8x8xf32>
    %c0_47 = arith.constant 0 : index
    %c3_48 = arith.constant 3 : index
    %c0_49 = arith.constant 0 : index
    %c0_50 = arith.constant 0 : index
    %52 = vector.load %arg7[%c0_47, %c3_48, %c0_49, %c0_50] : memref<1x4x8x8xf32, #tpu.memory_space<vmem>>, vector<1x1x8x8xf32>
    %53 = vector.shape_cast %52 : vector<1x1x8x8xf32> to vector<8x8xf32>
    %54 = vector.shape_cast %51 : vector<8x8xf32> to vector<1x1x8x8xf32>
    tpu.vector_store %arg7[%c0_47, %c3_48, %c0_49, %c0_50], %54 {strides = array<i32>} : memref<1x4x8x8xf32, #tpu.memory_space<vmem>>, vector<1x1x8x8xf32>,
    return
  }
  func.func @transform_0(%arg0: i32, %arg1: i32) -> (i32, i32, i32) {
    %c0_i32 = arith.constant 0 : i32
    %c0_i32_0 = arith.constant 0 : i32
    return %arg0, %arg1, %c0_i32 : i32, i32, i32
  }
  func.func @transform_1(%arg0: i32, %arg1: i32) -> (i32, i32) {
    %c0_i32 = arith.constant 0 : i32
    %c0_i32_0 = arith.constant 0 : i32
    %c0_i32_1 = arith.constant 0 : i32
    return %c0_i32, %c0_i32_0 : i32, i32
  }
  func.func @transform_2(%arg0: i32, %arg1: i32) -> (i32, i32) {
    %c0_i32 = arith.constant 0 : i32
    %c0_i32_0 = arith.constant 0 : i32
    %c0_i32_1 = arith.constant 0 : i32
    return %c0_i32, %c0_i32_0 : i32, i32
  }
  func.func @transform_3(%arg0: i32, %arg1: i32) -> (i32, i32, i32, i32) {
    %c0_i32 = arith.constant 0 : i32
    %c0_i32_0 = arith.constant 0 : i32
    %c0_i32_1 = arith.constant 0 : i32
    return %arg0, %c0_i32, %arg1, %c0_i32_0 : i32, i32, i32, i32
  }
  func.func @transform_4(%arg0: i32, %arg1: i32) -> (i32, i32, i32, i32) {
    %c0_i32 = arith.constant 0 : i32
    %c0_i32_0 = arith.constant 0 : i32
    %c0_i32_1 = arith.constant 0 : i32
    return %arg0, %c0_i32, %arg1, %c0_i32_0 : i32, i32, i32, i32
  }
  func.func @transform_5(%arg0: i32, %arg1: i32) -> (i32, i32, i32, i32) {
    %c0_i32 = arith.constant 0 : i32
    %c0_i32_0 = arith.constant 0 : i32
    %c0_i32_1 = arith.constant 0 : i32
    return %arg0, %c0_i32, %arg1, %c0_i32_0 : i32, i32, i32, i32
  }
}

</mosaic_0001>

<bundles_post_ra>
// kernel: tpu_custom_call.1
= control target key start
LH: loop header
LB: loop body
LE: loop exit
PB: predicated region body
PF: predicated region fallthrough
CT: control target
= control target key end

     0   :  { %11 = vsyncpa [#allocation3], 0  ;;  %s1498_s0 = inlined_call_operand.hbm [shape: f32[2,8,32], index: 0, kind: input, shape index: {}]   ;;  %s1499_s1 = inlined_call_operand.hbm [shape: f32[32,96], index: 1, kind: input, shape index: {}]   ;;  %s1500_s2 = inlined_call_operand.hbm [shape: f32[1,96], index: 2, kind: input, shape index: {}]   ;;  %s1501_s3 = inlined_call_operand.hbm [shape: f32[2,4,8,8], index: 3, kind: output, shape index: {0}]   ;;  %s1502_s4 = inlined_call_operand.hbm [shape: f32[2,4,8,8], index: 4, kind: output, shape index: {1}]   ;;  %s1503_s5 = inlined_call_operand.hbm [shape: f32[2,4,8,8], index: 5, kind: output, shape index: {2}]  }
   0x1   :  { %13 = vsyncpa [#allocation3 + $0x1], 0 }
   0x2   :  { %14 = vsyncpa [#allocation6], 0 }
   0x3   :  { %15 = vsyncpa [#allocation4], 0 }
   0x4   :  { %17 = vsyncpa [#allocation4 + $0x1], 0 }
   0x5   :  { %18 = vsyncpa [#allocation10], 0 }
   0x6   :  { %20 = vsyncpa [#allocation10 + $0x1], 0  ;;  %s1136_s18 = smov 0   ;;  %s1138_s19 = smov 0  }
   0x7   :  { %s1140_s20 = smov 0   ;;  %s1142_s21 = smov 0  }
   0x8   :  { %s1144_s22 = smov 0   ;;  %s1146_s23 = smov 0  }
   0x9 LB: > { %s1167_s24 = sadd.s32 4294967295, %s1080_s23   ;;  %s1507_s25 = sadd.s32 4294967294, %s1080_s23   ;;  %s1080_s23 = sphi %s1146_s23, %s26_s23   ;;  %s1076_s22 = sphi %s1144_s22, %s1528_s22   ;;  %s1072_s21 = sphi %s1142_s21, %s1527_s21   ;;  %s1068_s20 = sphi %s1140_s20, %s1526_s20   ;;  %s1064_s19 = sphi %s1138_s19, %s1525_s19   ;;  %s1060_s18 = sphi %s1136_s18, %s1524_s18  }
   0xa   : > { %p60_p0 = scmp.ne.s32.totalorder %s1064_s19, %s1060_s18  ;;  %p1504_p1 = scmp.eq.s32.totalorder %s1167_s24, 0 }
   0xb   : > { %p134_p3 = scmp.eq.s32.totalorder %s1507_s25, 1  ;;  %p677_p5 = scmp.ge.s32.totalorder %s1080_s23, 1 }
   0xc   : > { %p1178_p4 = por %p1504_p1, %p60_p0  ;;  %p197_p7 = scmp.lt.s32.totalorder %s1080_s23, 3 }
   0xd   : > { %p1183_p6 = por %p134_p3, %p60_p0  ;;  %s1082_s29 = smov [#allocation5]  }
   0xe   : > { %s1508_s26 = scalar_select %p1178_p4, 1, 0 }
   0xf   : > { %s1509_s27 = scalar_select %p1183_p6, 1, 0 }
  0x10   : > { %p1188_p8 = pnand %p677_p5, %p197_p7  ;;  %s209_s30 = sshll.u32 %s1082_s29, 4  ;;  %s1192_s30 = int_to_ptr.vmem [resolvable:$true] %s209_s30 }
  0x11   : > { %s1083_s7 = smov [#allocation7]   ;;  %s848_s11 = scalar_lea.hbm %s1499_s1, 512 }
  0x12   : > { %p753_p9 = pneg %p1188_p8  ;;  %s223_s8 = sshll.u32 %s1083_s7, 4  ;;  %s1203_s8 = int_to_ptr.vmem [resolvable:$true] %s223_s8 }
  0x13   : > { %p849_p12 = scmp.ne.s32.totalorder %s1499_s1, %s848_s11  ;;  %p855_p5 = scmp.lt.u32.totalorder %s848_s11, %s1499_s1 }
  0x14   : > { %p1199_p11 = pnand %p753_p9, %p1504_p1 }
  0x16   : > { %p850_p13 = pneg %p1199_p11 }
  0x18   : > { %p851_p0 = pnand %p850_p13, %p849_p12 }
  0x1a   : > { %p852_p3 = pneg %p851_p0 }
  0x1c   : > { %p857_p7 = pnand %p855_p5, %p852_p3 }
  0x1e   : > { %860 = shalt.err (!%p857_p7)
}
  0x1f   : > { %s861_s16 = scalar_lea.vmem %s1192_s30, 512  ;;  %p869_p2 = scmp.lt.s32.totalorder %s1192_s30, %s1192_s30 }
  0x20   : > { %p862_p9 = scmp.ne.s32.totalorder %s1192_s30, %s861_s16  ;;  %p870_p12 = scmp.lt.s32.totalorder %s861_s16, %s861_s16 }
  0x22   : > { %p864_p10 = pnand %p862_p9, %p850_p13  ;;  %p871_p0 = por %p870_p12, %p869_p2 }
  0x24   : > { %p865_p1 = pneg %p864_p10 }
  0x26   : > { %p872_p6 = pnand %p871_p0, %p865_p1 }
  0x28   : > { %875 = shalt.err (!%p872_p6)
}
  0x29   : > { %s1084_s17 = smov 128   ;;  %s1085_s29 = smov 8  }
  0x2a   : > { %756 = dma.hbm_to_vmem [thread:$0]  (!%p1199_p11), %s1499_s1, 512, %s1192_s30, [#allocation6], %s1084_s17, %s1084_s17, %s1085_s29  }
  0x2b   : > { %s876_s12 = scalar_lea.hbm %s1500_s2, 16 }
  0x2c   : > { %p877_p2 = scmp.ne.s32.totalorder %s1500_s2, %s876_s12  ;;  %p883_p10 = scmp.lt.u32.totalorder %s876_s12, %s1500_s2 }
  0x2e   : > { %p879_p1 = pnand %p877_p2, %p850_p13 }
  0x30   : > { %p880_p6 = pneg %p879_p1 }
  0x32   : > { %p885_p3 = pnand %p883_p10, %p880_p6 }
  0x34   : > { %888 = shalt.err (!%p885_p3)
}
  0x35   : > { %s889_s30 = scalar_lea.vmem %s1203_s8, 16  ;;  %s896_s17 = scalar_lea.vmem %s1203_s8, 32 }
  0x36   : > { %p890_p5 = scmp.ne.s32.totalorder %s1203_s8, %s889_s30  ;;  %p897_p12 = scmp.lt.s32.totalorder %s1203_s8, %s1203_s8 }
  0x37   : > { %p898_p0 = scmp.lt.s32.totalorder %s896_s17, %s889_s30 }
  0x38   : > { %p892_p7 = pnand %p890_p5, %p850_p13 }
  0x39   : > { %p899_p2 = por %p898_p0, %p897_p12 }
  0x3a   : > { %p893_p9 = pneg %p892_p7 }
  0x3c   : > { %p900_p1 = pnand %p899_p2, %p893_p9 }
  0x3e   : > { %903 = shalt.err (!%p900_p1)
}
  0x3f   : > { %759 = dma.hbm_to_vmem [thread:$0]  (!%p1199_p11), %s1500_s2, 16, %s1203_s8, [#allocation6]  }
  0x40   : > { %s38_s9 = sadd.s32 1, %s1076_s22  ;;  %s47_s10 = sadd.s32 1, %s1068_s20 }
  0x41   : > { %p40_p13 = scmp.ge.s32.totalorder %s38_s9, 2  ;;  %p54_p6 = scmp.ne.s32.totalorder %s1068_s20, %s1064_s19 }
  0x42   : > { %p55_p10 = scmp.eq.s32.totalorder %s1080_s23, 0  ;;  %p776_p3 = scmp.lt.s32.totalorder %s1080_s23, 2 }
  0x43   : > { %s1530_s9 = smov (%p40_p13, %s38_s9), 0  ;;  %p1512_p7 = scmp.eq.s32.totalorder %s1167_s24, 1 }
  0x44   : > { %p56_p5 = por %p55_p10, %p54_p6  ;;  %s42_s11 = ssub.s32 %s1076_s22, %s1530_s9 }
  0x45   : > { %p1268_p9 = por %p1512_p7, %p54_p6  ;;  %s234_s12 = sand.u32 1, %s1068_s20  }
  0x46   : > { %p45_p12 = scmp.eq.s32.totalorder %s42_s11, 0  ;;  %s681_s8 = sshll.u32 %s234_s12, 3 }
  0x47   : > { %s1513_s6 = scalar_select %p1268_p9, 1, 0 }
  0x48   : > { %s682_s13 = sshll.u32 %s1076_s22, 7  ;;  %s238_s17 = scalar_lea.vmem [#allocation2], %s681_s8 }
  0x49   : > { %s1277_s14 = scalar_select %p45_p12, %s1068_s20, %s47_s10  }
  0x4a   : > { %s1282_s30 = scalar_lea.hbm %s1498_s0, %s682_s13  ;;  %s246_s29 = sshll.u32 %s238_s17, 4  ;;  %s1290_s29 = int_to_ptr.vmem [resolvable:$true] %s246_s29 }
  0x4b   : > { %p1286_p11 = pnand %p776_p3, %p56_p5  ;;  %s235_s10 = scalar_lea.sflag [#allocation3], %s234_s12 }
  0x4c   : > { %s904_s11 = scalar_lea.hbm %s1282_s30, 128  ;;  %s909_s15 = scalar_lea.hbm %s1498_s0, 256 }
  0x4d   : > { %p905_p0 = scmp.ne.s32.totalorder %s1282_s30, %s904_s11  ;;  %p906_p2 = pneg %p1286_p11 }
  0x4e   : > { %p910_p6 = scmp.lt.u32.totalorder %s1282_s30, %s1498_s0  ;;  %p911_p10 = scmp.lt.u32.totalorder %s909_s15, %s904_s11 }
  0x4f   : > { %p907_p1 = pnand %p906_p2, %p905_p0  ;;  %p913_p5 = scmp.lt.u32.totalorder %s904_s11, %s1282_s30 }
  0x50   : > { %p912_p3 = por %p911_p10, %p910_p6 }
  0x51   : > { %p908_p13 = pneg %p907_p1 }
  0x52   : > { %p914_p7 = por %p913_p5, %p912_p3 }
  0x54   : > { %p915_p12 = pnand %p914_p7, %p908_p13 }
  0x56   : > { %918 = shalt.err (!%p915_p12)
}
  0x57   : > { %s919_s12 = scalar_lea.vmem %s1290_s29, 128  ;;  %s1086_s8 = smov [#allocation2]  }
  0x58   : > { %p920_p0 = scmp.ne.s32.totalorder %s1290_s29, %s919_s12  ;;  %s924_s13 = sshll.u32 %s1086_s8, 4  ;;  %s925_s13 = int_to_ptr.vmem [resolvable:$false] %s924_s13 }
  0x59   : > { %s926_s16 = scalar_lea.vmem %s925_s13, 256  ;;  %p927_p4 = scmp.lt.s32.totalorder %s1290_s29, %s925_s13 }
  0x5a   : > { %p922_p1 = pnand %p920_p0, %p906_p2  ;;  %p928_p6 = scmp.lt.s32.totalorder %s926_s16, %s919_s12 }
  0x5c   : > { %p923_p9 = pneg %p922_p1  ;;  %p929_p10 = por %p928_p6, %p927_p4 }
  0x5e   : > { %p930_p3 = pnand %p929_p10, %p923_p9 }
  0x60   : > { %933 = shalt.err (!%p930_p3)
}
  0x61   : > { %763 = dma.hbm_to_vmem [thread:$0]  (!%p1286_p11), %s1282_s30, 128, %s1290_s29, %s235_s10  }
  0x62   : > { %255 = sbr.rel (%p1188_p8) target bundleno = 515 (0x203), region = 32  ;;  %s1320_s11 = sand.u32 (!%p1188_p8), 1, %s1064_s19  }
  0x63   : > { %s684_s15 = sshll.u32 (!%p1188_p8), %s1320_s11, 3  ;;  %s258_s17 = scalar_lea.sflag (!%p1188_p8), [#allocation3], %s1320_s11 }
  0x64   : > { %s261_s12 = scalar_lea.vmem (!%p1188_p8), [#allocation2], %s684_s15  ;;  %p1515_p4 = scmp.ne.s32.totalorder (!%p1188_p8), %s1508_s26, 0 }
  0x69   : > { %1043 = dma.done.wait (%p1515_p4), %s258_s17, 128  }
  0x6a   : > { %1045 = vsyncadd (%p1515_p4), %s258_s17, 4294967168  ;;  %p1516_p9 = scmp.eq.s32.totalorder %s1167_s24, 0 }
  0x6c   : > { %1047 = dma.done.wait (%p1516_p9), [#allocation6], 528   ;;  %p1517_p11 = pmov %p1516_p9 }
  0x6d   : > { %v1087_v0 = vmov 0.0|0.0   ;;  %vm1088_vm0 = vmmov 0   ;;  %v1089_v1 = vmov 0.0   ;;  %v307_v2 = vld [vmem:[#allocation5] sm:$0xff]  ;;  %v308_v3 = vld [vmem:[#allocation5 + $0x8] sm:$0xff]  ;;  %v309_v4 = vld [vmem:[#allocation5 + $0x10] sm:$0xff] }
  0x6e   : > { %1049 = vsyncadd (%p1517_p11), [#allocation6], 4294966768  ;;  %731 = vmatprep.subr.bf16.mxu0 %v1087_v0  ;;  %728 = vmatprep.mubr.msk.f32.mxu0 %vm1088_vm0, %v1089_v1  ;;  %v732_v5 = vpack.c.bf16 %v308_v3, %v307_v2  ;;  %v310_v6 = vld [vmem:[#allocation5 + $0x18] sm:$0xff]  ;;  %vm318_vm1 = vcmask 261120   ;;  %s1333_s26 = sshll.u32 %s1320_s11, 5  ;;  %vm392_vm2 = vcmask 64512  }
  0x6f   : > { %v735_v7 = vpack.c.bf16 %v310_v6, %v309_v4  ;;  %v306_v8 = vld [vmem:[%s261_s12] sm:$0xff]  ;;  %v690_v9 = vld [vmem:[#allocation7] ss:$0 sm:$0xff]  ;;  %s1090_s28 = smov 80   ;;  %s1091_s30 = smov 96  }
  0x70   : > { %733 = vmatpush3.bf16.msra.mxu0 %v732_v5  ;;  %s1336_s29 = scalar_lea.vmem [#allocation8], %s1333_s26  ;;  %s1092_s7 = smov 72  }
  0x71   : > { %734 = vmatprep.subr.bf16.mxu0 %v1087_v0  ;;  %s1093_s10 = smov 88   ;;  %s1094_s8 = smov 120  }
  0x72   : > { %s1095_s13 = smov 64   ;;  %s1096_s16 = smov 112  }
  0x73   : > { %s1097_s15 = smov 56   ;;  %s1098_s17 = smov 104  }
  0x74   : > { %736 = vmatpush3.bf16.msra.mxu0 %v735_v7  ;;  %s1099_s12 = smov 48   ;;  %p1518_p2 = scmp.ne.s32.totalorder %s1513_s6, 0 }
  0x77   : > { %729 = vmatmul.mubr.msk.f32.vlgmr.msra.gmra.mrb[0].mxu0 %vm318_vm1, %v306_v8 }
 0x14a   : > { %v388_v10 = vpop.f32.mrb[0].mxu0 }
 0x14b   : > { %v389_v11 = vadd.f32 %v690_v9, %v388_v10  ;;  %v730_v12 = vpop.f32.mrb[1].mxu0 }
 0x14d   : > { %423 = vrot.lane.b32.xlu1 %v389_v11, %s1090_s28  ;;  %395 = vrot.lane.b32.xlu0 %v389_v11, %s1091_s30  ;;  %393 = vst.msk [vmem:[%s1336_s29] sm:$0xff] %vm392_vm2, %v389_v11  ;;  %s1100_s28 = smov 40   ;;  %s298_s30 = scalar_lea.vmem [#allocation9], %s1333_s26 }
 0x151   : > { %438 = vrot.lane.b32.xlu1 %v389_v11, %s1092_s7  ;;  %408 = vrot.lane.b32.xlu0 %v389_v11, %s1093_s10  ;;  %s490_s7 = sshll.u32 %s298_s30, 4  ;;  %s453_s10 = sand.u32 1, %s1167_s24   ;;  %s1345_s7 = int_to_ptr.vmem [resolvable:$true] %s490_s7 }
 0x152   : > { %s934_s24 = scalar_lea.vmem %s1345_s7, 512 }
 0x153   : > { %p935_p8 = scmp.ne.s32.totalorder %s1345_s7, %s934_s24 }
 0x155   : > { %403 = vrot.lane.b32.xlu1 %v389_v11, %s1094_s8  ;;  %399 = vrot.lane.b32.xlu0 %v389_v11, %s1095_s13  ;;  %s1343_s8 = sshll.u32 %s1072_s21, 9  ;;  %s1357_s21 = scalar_lea.sflag [#allocation10], %s453_s10 }
 0x156   : > { %p936_p13 = pnand %p935_p8, %p1518_p2 }
 0x158   : > { %p937_p5 = pneg %p936_p13 }
 0x159   : > { %418 = vrot.lane.b32.xlu1 %v389_v11, %s1096_s16  ;;  %413 = vrot.lane.b32.xlu0 %v389_v11, %s1097_s15  ;;  %s1353_s15 = scalar_lea.hbm %s1502_s4, %s1343_s8 }
 0x15d   : > { %433 = vrot.lane.b32.xlu1 %v389_v11, %s1098_s17  ;;  %428 = vrot.lane.b32.xlu0 %v389_v11, %s1099_s12  ;;  %s1101_s17 = smov [#allocation9]  }
 0x15e   : > { %s938_s12 = sshll.u32 %s1101_s17, 4  ;;  %s939_s12 = int_to_ptr.vmem [resolvable:$false] %s938_s12 }
 0x15f   : > { %p941_p7 = scmp.lt.s32.totalorder %s1345_s7, %s939_s12 }
 0x161   : > { %443 = vrot.lane.b32.xlu0 %v389_v11, %s1100_s28  ;;  %s940_s28 = scalar_lea.vmem %s939_s12, 1024 }
 0x162   : > { %p942_p12 = scmp.lt.s32.totalorder %s940_s28, %s934_s24 }
 0x164   : > { %p943_p0 = por %p942_p12, %p941_p7 }
 0x166   : > { %p944_p1 = pnand %p943_p0, %p937_p5 }
 0x1bf   : > { %v424_v13 = vpop.permute.xlu1 %423  ;;  %v396_v14 = vpop.permute.xlu0 %395 }
 0x1c0   : > { %696 = vst.msk [vmem:[%s298_s30 + $0x10] sm:$0xff] %vm392_vm2, %v424_v13  ;;  %398 = vst.msk [vmem:[%s298_s30] sm:$0xff] %vm392_vm2, %v396_v14 }
 0x1c3   : > { %v439_v15 = vpop.permute.xlu1 %438  ;;  %v409_v16 = vpop.permute.xlu0 %408 }
 0x1c4   : > { %699 = vst.msk [vmem:[%s298_s30 + $0x18] sm:$0xff] %vm392_vm2, %v439_v15  ;;  %693 = vst.msk [vmem:[%s298_s30 + $0x8] sm:$0xff] %vm392_vm2, %v409_v16 }
 0x1c5   : > { %947 = shalt.err (!%p944_p1)
}
 0x1c6   : > { %s948_s30 = scalar_lea.hbm %s1353_s15, 512  ;;  %s952_s16 = scalar_lea.hbm %s1502_s4, 1024 }
 0x1c7   : > { %p949_p6 = scmp.ne.s32.totalorder %s1353_s15, %s948_s30  ;;  %p953_p4 = scmp.lt.u32.totalorder %s1353_s15, %s1502_s4 }
 0x1c8   : > { %p954_p9 = scmp.lt.u32.totalorder %s952_s16, %s948_s30  ;;  %p956_p8 = scmp.lt.u32.totalorder %s948_s30, %s1353_s15 }
 0x1c9   : > { %p950_p10 = pnand %p949_p6, %p1518_p2 }
 0x1ca   : > { %p955_p11 = por %p954_p9, %p953_p4 }
 0x1cb   : > { %p951_p3 = pneg %p950_p10 }
 0x1cc   : > { %p957_p13 = por %p956_p8, %p955_p11 }
 0x1ce   : > { %p958_p5 = pnand %p957_p13, %p951_p3 }
 0x1d0   : > { %961 = shalt.err (!%p958_p5)
}
 0x1d1   : > { %s1102_s24 = smov 128   ;;  %s1103_s28 = smov 8   ;;  %v404_v17 = vpop.permute.xlu1 %403  ;;  %v400_v18 = vpop.permute.xlu0 %399 }
 0x1d2   : > { %748 = dma.vmem_to_hbm [thread:$0]  (%p1518_p2), %s1345_s7, 512, %s1353_s15, %s1357_s21, %s1102_s24, %s1102_s24, %s1103_s28  }
 0x1d3   : > { %692 = vst.msk [vmem:[%s1336_s29 + $0x8] sm:$0xff] %vm392_vm2, %v404_v17  ;;  %s1387_s30 = scalar_lea.vmem [#allocation11], %s1333_s26  ;;  %s473_s10 = sshll.u32 %s1336_s29, 4  ;;  %s1396_s10 = int_to_ptr.vmem [resolvable:$true] %s473_s10 }
 0x1d4   : > { %402 = vst.msk [vmem:[%s1387_s30] sm:$0xff] %vm392_vm2, %v400_v18  ;;  %s1402_s26 = scalar_lea.hbm %s1501_s3, %s1343_s8  ;;  %s962_s17 = scalar_lea.vmem %s1396_s10, 512 }
 0x1d5   : > { %v419_v19 = vpop.permute.xlu1 %418  ;;  %v414_v20 = vpop.permute.xlu0 %413  ;;  %p963_p7 = scmp.ne.s32.totalorder %s1396_s10, %s962_s17  ;;  %s1104_s12 = smov [#allocation8]  }
 0x1d6   : > { %695 = vst.msk [vmem:[%s1336_s29 + $0x10] sm:$0xff] %vm392_vm2, %v419_v19  ;;  %694 = vst.msk [vmem:[%s1387_s30 + $0x8] sm:$0xff] %vm392_vm2, %v414_v20  ;;  %s966_s7 = sshll.u32 %s1104_s12, 4  ;;  %s967_s7 = int_to_ptr.vmem [resolvable:$false] %s966_s7 }
 0x1d7   : > { %p964_p12 = pnand %p963_p7, %p1518_p2  ;;  %s968_s15 = scalar_lea.vmem %s967_s7, 1024 }
 0x1d8   : > { %p969_p1 = scmp.lt.s32.totalorder %s1396_s10, %s967_s7  ;;  %p970_p6 = scmp.lt.s32.totalorder %s968_s15, %s962_s17 }
 0x1d9   : > { %v434_v21 = vpop.permute.xlu1 %433  ;;  %v429_v22 = vpop.permute.xlu0 %428  ;;  %p965_p0 = pneg %p964_p12 }
 0x1da   : > { %698 = vst.msk [vmem:[%s1336_s29 + $0x18] sm:$0xff] %vm392_vm2, %v434_v21  ;;  %697 = vst.msk [vmem:[%s1387_s30 + $0x10] sm:$0xff] %vm392_vm2, %v429_v22  ;;  %p971_p10 = por %p970_p6, %p969_p1 }
 0x1dc   : > { %p972_p3 = pnand %p971_p10, %p965_p0 }
 0x1de   : > { %975 = shalt.err (!%p972_p3)
}
 0x1df   : > { %s976_s29 = scalar_lea.hbm %s1402_s26, 512  ;;  %s980_s12 = scalar_lea.hbm %s1501_s3, 1024 }
 0x1e0   : > { %p977_p4 = scmp.ne.s32.totalorder %s1402_s26, %s976_s29  ;;  %p981_p8 = scmp.lt.u32.totalorder %s1402_s26, %s1501_s3 }
 0x1e1   : > { %p982_p13 = scmp.lt.u32.totalorder %s980_s12, %s976_s29  ;;  %p984_p7 = scmp.lt.u32.totalorder %s976_s29, %s1402_s26 }
 0x1e2   : > { %p978_p9 = pnand %p977_p4, %p1518_p2 }
 0x1e3   : > { %p983_p5 = por %p982_p13, %p981_p8 }
 0x1e4   : > { %p979_p11 = pneg %p978_p9 }
 0x1e5   : > { %p985_p12 = por %p984_p7, %p983_p5 }
 0x1e7   : > { %p986_p0 = pnand %p985_p12, %p979_p11 }
 0x1e9   : > { %989 = shalt.err (!%p986_p0)
}
 0x1ea   : > { %s1519_s17 = scalar_lea.sflag [#allocation4], %s1320_s11  ;;  %s1520_s25 = sshll.u32 %s1387_s30, 4  ;;  %v444_v23 = vpop.permute.xlu0 %443  ;;  %s1438_s25 = int_to_ptr.vmem [resolvable:$true] %s1520_s25 }
 0x1eb   : > { %747 = dma.vmem_to_hbm [thread:$0]  (%p1518_p2), %s1396_s10, 512, %s1402_s26, %s1519_s17, %s1102_s24, %s1102_s24, %s1103_s28  }
 0x1ec   : > { %s1444_s15 = scalar_lea.hbm %s1503_s5, %s1343_s8  ;;  %700 = vst.msk [vmem:[%s1387_s30 + $0x18] sm:$0xff] %vm392_vm2, %v444_v23  ;;  %s990_s11 = scalar_lea.vmem %s1438_s25, 512 }
 0x1ed   : > { %p991_p1 = scmp.ne.s32.totalorder %s1438_s25, %s990_s11  ;;  %s1105_s10 = smov [#allocation11]  }
 0x1ee   : > { %s994_s26 = sshll.u32 %s1105_s10, 4  ;;  %s995_s26 = int_to_ptr.vmem [resolvable:$false] %s994_s26 }
 0x1ef   : > { %p992_p6 = pnand %p991_p1, %p1518_p2  ;;  %s996_s29 = scalar_lea.vmem %s995_s26, 1024 }
 0x1f0   : > { %p997_p3 = scmp.lt.s32.totalorder %s1438_s25, %s995_s26  ;;  %p998_p4 = scmp.lt.s32.totalorder %s996_s29, %s990_s11 }
 0x1f1   : > { %p993_p10 = pneg %p992_p6 }
 0x1f2   : > { %p999_p9 = por %p998_p4, %p997_p3 }
 0x1f4   : > { %p1000_p11 = pnand %p999_p9, %p993_p10 }
 0x1f6   : > { %1003 = shalt.err (!%p1000_p11)
}
 0x1f7   : > { %s1004_s8 = scalar_lea.hbm %s1444_s15, 512  ;;  %s1008_s7 = scalar_lea.hbm %s1503_s5, 1024 }
 0x1f8   : > { %p1005_p8 = scmp.ne.s32.totalorder %s1444_s15, %s1004_s8  ;;  %p1009_p7 = scmp.lt.u32.totalorder %s1444_s15, %s1503_s5 }
 0x1f9   : > { %p1010_p12 = scmp.lt.u32.totalorder %s1008_s7, %s1004_s8  ;;  %p1012_p1 = scmp.lt.u32.totalorder %s1004_s8, %s1444_s15 }
 0x1fa   : > { %p1006_p13 = pnand %p1005_p8, %p1518_p2 }
 0x1fb   : > { %p1011_p0 = por %p1010_p12, %p1009_p7 }
 0x1fc   : > { %p1007_p5 = pneg %p1006_p13 }
 0x1fd   : > { %p1013_p6 = por %p1012_p1, %p1011_p0 }
 0x1ff   : > { %p1014_p10 = pnand %p1013_p6, %p1007_p5 }
 0x201   : > { %1017 = shalt.err (!%p1014_p10)
}
 0x202   : > { %749 = dma.vmem_to_hbm [thread:$0]  (%p1518_p2), %s1438_s25, 512, %s1444_s15, %s1357_s21, %s1102_s24, %s1102_s24, %s1103_s28  }
 0x203 PF: > { %s522_s16 = sand.u32 1, %s1060_s18   ;;  %p1521_p3 = scmp.ne.s32.totalorder %s1509_s27, 0 }
 0x204   : > { %p1522_p4 = scmp.ge.s32.totalorder %s1080_s23, 2  ;;  %s523_s11 = scalar_lea.sflag [#allocation4], %s522_s16 }
 0x206   : > { %p765_p9 = pnand %p1522_p4, %p1521_p3 }
 0x208   : > { %1051 = dma.done.wait (!%p765_p9), %s523_s11, 512  }
 0x209   : > { %1053 = vsyncadd (!%p765_p9), %s523_s11, 4294966784  ;;  %s1523_s6 = sadd.s32 4294967294, %s1080_s23  }
 0x20a   : > { %s531_s10 = sand.u32 1, %s1523_s6  }
 0x20b   : > { %s532_s26 = scalar_lea.sflag [#allocation10], %s531_s10 }
 0x20c   : > { %1055 = dma.done.wait (!%p765_p9), %s532_s26, 1024  }
 0x20d   : > { %1057 = vsyncadd (!%p765_p9), %s532_s26, 4294966272  ;;  %s26_s23 = sadd.s32 1, %s1080_s23   ;;  %s1524_s18 = smov %s1064_s19 }
 0x20e   : > { %p23_p2 = scmp.ge.s32.totalorder %s26_s23, 4   ;;  %s1525_s19 = smov %s1068_s20 }
 0x20f   : > { %s1526_s20 = smov %s1277_s14  ;;  %s1527_s21 = smov %s1076_s22 }
 0x210   : > { %s1528_s22 = smov %s1530_s9  ;;  %25 = sbr.rel (!%p23_p2) target bundleno = 9 (0x9), region = 126 }
 0x217   :  { %546 = vsyncpa [#allocation3], 1 }
 0x218   :  { %548 = vsyncpa [#allocation3 + $0x1], 1 }
 0x219   :  { %549 = vsyncpa [#allocation6], 1 }
 0x21a   :  { %550 = vsyncpa [#allocation4], 1 }
 0x21b   :  { %552 = vsyncpa [#allocation4 + $0x1], 1 }
 0x21c   :  { %553 = vsyncpa [#allocation10], 1 }
 0x21d   :  { %555 = vsyncpa [#allocation10 + $0x1], 1 }

</bundles_post_ra>
